<compile_context>
chip_gen: v5e
topology: v5e:2x2
jax: 0.10.0
libtpu: 0.0.40
codegen_flags: <defaults>
</compile_context>

<pallas_src>
import functools

import jax
import jax.numpy as jnp
from jax import lax
from jax.experimental import pallas as pl
from jax.experimental.pallas import tpu as pltpu


_MiB = 1024 * 1024
# Target bytes per (M, tk) feature tile (double-buffered by the pipeline).
_TILE_TARGET_BYTES = 2 * _MiB


@functools.lru_cache(maxsize=1)
def _is_v7x():
    try:
        return "v7" in jax.devices()[0].device_kind.lower()
    except Exception:  # pragma: no cover - defensive
        return False


def _plan(x_shape, itemsize):
    """Pick the K-tile size, TC-split count and grid for an NCHW feature map."""
    a, b, c, d = x_shape
    M, K = a * b, c * d
    # Adaptive, lane-aligned K tile: ~_TILE_TARGET_BYTES per tile, >= 512 lanes.
    tk = max((_TILE_TARGET_BYTES // max(M * itemsize, 1)) // 128 * 128, 512)
    if tk >= K:
        tk = K                      # single full-K tile (full-dim block is legal)
    num_k = pl.cdiv(K, tk)
    mask_last = (K % tk) != 0       # ragged last tile must be zeroed in-kernel
    # v7x has 2 TensorCores: split the K reduction across them when it divides
    # evenly.  On v5e/v6e (1 TC) a split is pure overhead, so keep splits = 1.
    splits = 2 if (_is_v7x() and num_k >= 2 and num_k % 2 == 0) else 1
    nk_per = num_k // splits
    return M, K, tk, num_k, nk_per, splits, mask_last


def _vmem_bytes(M, tk, itemsize, *, n_mm_blocks, n_acc):
    """Scoped-VMEM request sized to the actual buffers (plus compiler slack)."""
    need = 2 * M * tk * itemsize          # double-buffered feature tile
    need += n_mm_blocks * M * M * 4       # (M, M) output / target VMEM windows
    need += n_acc * M * M * 4             # f32 accumulator scratch (fused path)
    need += 4 * _MiB                      # compiler-internal slack
    cap = 48 * _MiB if _is_v7x() else 100 * _MiB   # never ask for all of v7x VMEM
    return int(min(max(need, 16 * _MiB), cap))


def _masked_features(f_ref, global_tile_idx, K, tk, mask_last):
    """Load the feature tile in native dtype; zero the ragged tail of the last tile."""
    f = f_ref[...]
    if mask_last:
        rem = K - global_tile_idx * tk        # >= tk on every non-last tile
        lane = lax.broadcasted_iota(jnp.int32, f.shape, 1)
        f = jnp.where(lane < rem, f, jnp.zeros_like(f))
    return f


def _gram_partial_kernel(f_ref, g_ref, *, K, tk, nk_per, inv_gram_scale, mask_last):
    """Partial gram for one TC-split; accumulates directly into the output block."""
    s = pl.program_id(0)          # TC split (parallel)
    k = pl.program_id(1)          # K-tile within this split (arbitrary/reduction)

    @pl.when(k == 0)
    def _():
        g_ref[...] = jnp.zeros_like(g_ref)

    f = _masked_features(f_ref, s * nk_per + k, K, tk, mask_last)
    # f @ f.T, contracting the wide last dim of both operands (no transpose).
    g_ref[...] += lax.dot_general(
        f, f,
        dimension_numbers=(((1,), (1,)), ((), ())),
        preferred_element_type=jnp.float32,
    )

    @pl.when(k == nk_per - 1)
    def _():
        g_ref[...] *= inv_gram_scale


def _style_loss_kernel(f_ref, t_ref, loss_ref, acc_ref, *,
                       K, tk, inv_gram_scale, inv_mse_scale, mask_last):
    """Fused gram + MSE (single-TC path); scalar loss goes to SMEM."""
    k = pl.program_id(0)

    @pl.when(k == 0)
    def _():
        acc_ref[...] = jnp.zeros_like(acc_ref)

    f = _masked_features(f_ref, k, K, tk, mask_last)
    acc_ref[...] += lax.dot_general(
        f, f,
        dimension_numbers=(((1,), (1,)), ((), ())),
        preferred_element_type=jnp.float32,
    )

    @pl.when(k == pl.num_programs(0) - 1)
    def _():
        diff = acc_ref[...] * inv_gram_scale - t_ref[...]
        loss_ref[0, 0] = jnp.sum(diff * diff) * inv_mse_scale


def gram_matrix(x, compute_dtype=None):
    """Pallas-backed equivalent of the PyTorch gram_matrix()."""
    a, b, c, d = x.shape
    feats = x.reshape(a * b, c * d)           # reshape only — no host-side pad
    if compute_dtype is not None:
        feats = feats.astype(compute_dtype)
    itemsize = jnp.dtype(feats.dtype).itemsize
    M, K, tk, num_k, nk_per, splits, mask_last = _plan(x.shape, itemsize)

    kernel = functools.partial(
        _gram_partial_kernel, K=K, tk=tk, nk_per=nk_per,
        inv_gram_scale=1.0 / (a * b * c * d), mask_last=mask_last)

    cost = pl.CostEstimate(
        flops=2 * M * M * K,
        transcendentals=0,
        bytes_accessed=M * K * itemsize + splits * M * M * 4,
    )

    parts = pl.pallas_call(
        kernel,
        out_shape=jax.ShapeDtypeStruct((splits, M, M), jnp.float32),
        grid_spec=pltpu.PrefetchScalarGridSpec(
            num_scalar_prefetch=0,
            grid=(splits, nk_per),
            in_specs=[pl.BlockSpec((M, tk), lambda s, k: (0, s * nk_per + k))],
            # Constant index across k -> resident accumulator block; no scratch.
            out_specs=pl.BlockSpec((None, M, M), lambda s, k: (s, 0, 0)),
        ),
        compiler_params=pltpu.CompilerParams(
            dimension_semantics=("parallel", "arbitrary"),
            vmem_limit_bytes=_vmem_bytes(M, tk, itemsize, n_mm_blocks=2, n_acc=0),
        ),
        cost_estimate=cost,
    )(feats)

    return parts[0] if splits == 1 else parts.sum(axis=0)


class StyleLoss:
    """JAX/Pallas port of the PyTorch StyleLoss module (pass-through forward)."""

    def __init__(self, target_feature, compute_dtype=None):
        self.compute_dtype = compute_dtype
        # Target gram computed once with the Pallas kernel, stored f32 at (M, M)
        # ("detached" constant); no per-forward pad/slice round trips.
        self.target = lax.stop_gradient(
            gram_matrix(target_feature, compute_dtype).astype(jnp.float32))
        self.loss = None

    def forward(self, x):
        a, b, c, d = x.shape
        feats = x.reshape(a * b, c * d)       # reshape only — no host-side pad
        if self.compute_dtype is not None:
            feats = feats.astype(self.compute_dtype)
        itemsize = jnp.dtype(feats.dtype).itemsize
        M, K, tk, num_k, nk_per, splits, mask_last = _plan(x.shape, itemsize)
        assert self.target.shape == (M, M), "input/target channel-batch mismatch"

        if splits == 1:
            # Single-TC path: fused gram + MSE, no HBM round trip for G.
            kernel = functools.partial(
                _style_loss_kernel, K=K, tk=tk,
                inv_gram_scale=1.0 / (a * b * c * d),
                inv_mse_scale=1.0 / (M * M),
                mask_last=mask_last)
            cost = pl.CostEstimate(
                flops=2 * M * M * K + 3 * M * M,
                transcendentals=0,
                bytes_accessed=M * K * itemsize + M * M * 4 + 4,
            )
            loss = pl.pallas_call(
                kernel,
                out_shape=jax.ShapeDtypeStruct((1, 1), jnp.float32),
                grid_spec=pltpu.PrefetchScalarGridSpec(
                    num_scalar_prefetch=0,
                    grid=(num_k,),
                    in_specs=[
                        pl.BlockSpec((M, tk), lambda k: (0, k)),
                        # Constant index_map -> fetched once by the pipeline.
                        # (Kept default-buffered for robustness; single-buffering
                        # it would reclaim another M*M*4 bytes of VMEM.)
                        pl.BlockSpec((M, M), lambda k: (0, 0)),
                    ],
                    # Scalar loss lives in SMEM: no masked partial VMEM store.
                    out_specs=pl.BlockSpec(memory_space=pltpu.MemorySpace.SMEM),
                    scratch_shapes=[pltpu.VMEM((M, M), jnp.float32)],
                ),
                compiler_params=pltpu.CompilerParams(
                    dimension_semantics=("arbitrary",),
                    vmem_limit_bytes=_vmem_bytes(M, tk, itemsize,
                                                 n_mm_blocks=2, n_acc=1),
                ),
                cost_estimate=cost,
            )(feats, self.target)[0, 0]
        else:
            # v7x path: K reduction split across both TensorCores (Pallas),
            # trivial (M, M) sum + MSE epilogue in XLA.
            G = gram_matrix(x, self.compute_dtype)
            loss = jnp.mean((G - self.target) ** 2)

        self.loss = loss
        # forward returns its input unchanged (pass-through), like PyTorch.
        return x

    __call__ = forward


def _reference_loss(x, target_feature):
    """Pure-JAX reference for correctness checking."""
    def gram(t):
        a, b, c, d = t.shape
        f = t.reshape(a * b, c * d).astype(jnp.float32)
        return (f @ f.T) / (a * b * c * d)

    return jnp.mean((gram(x) - gram(target_feature)) ** 2)


if __name__ == "__main__":
    key = jax.random.PRNGKey(0)
    k1, k2 = jax.random.split(key)

    # --- Test 1: small NCHW feature maps (single full-K tile path) -----------
    target_feature = jax.random.normal(k1, (2, 4, 16, 16), dtype=jnp.float32)
    x = jax.random.normal(k2, (2, 4, 16, 16), dtype=jnp.float32)

    style = StyleLoss(target_feature)
    out = jax.block_until_ready(style(x))
    loss = jax.block_until_ready(style.loss)

    ref = _reference_loss(x, target_feature)
    assert out.shape == x.shape
    assert jnp.allclose(out, x)
    assert jnp.allclose(loss, ref, rtol=2e-5, atol=1e-6), (loss, ref)

    # --- Test 2: force tiny K tiles to exercise the multi-tile reduction and
    # the in-kernel ragged-last-tile masking (K = 576, tk = 512) --------------
    _TILE_TARGET_BYTES = 4096
    tf2 = jax.random.normal(k1, (2, 4, 24, 24), dtype=jnp.float32)
    x2 = jax.random.normal(k2, (2, 4, 24, 24), dtype=jnp.float32)

    style2 = StyleLoss(tf2)
    out2 = jax.block_until_ready(style2(x2))
    loss2 = jax.block_until_ready(style2.loss)

    ref2 = _reference_loss(x2, tf2)
    assert out2.shape == x2.shape
    assert jnp.allclose(loss2, ref2, rtol=2e-5, atol=1e-6), (loss2, ref2)

    print("KERNEL_OK")
</pallas_src>

<mosaic_0001>
module attributes {stable_mosaic.version = 11 : i64} {
  func.func @_gram_partial_kernel(%arg0: i32, %arg1: i32, %arg2: memref<8x256xf32, #tpu.memory_space<vmem>>, %arg3: memref<1x8x8xf32, #tpu.memory_space<vmem>>) attributes {dimension_semantics = [#tpu.dimension_semantics<parallel>, #tpu.dimension_semantics<arbitrary>], iteration_bounds = array<i64: 1, 1>, scalar_prefetch = 0 : i64, scratch_operands = 0 : i64, tpu.core_type = #tpu.core_type<tc>, window_params = [{transform_indices = @transform_0, window_bounds = array<i64: 8, 256>}, {transform_indices = @transform_1, window_bounds = array<i64: 1, 8, 8>}]} {
    %c0_i32 = arith.constant 0 : i32
    %0 = arith.cmpi eq, %arg1, %c0_i32 : i32
    %1 = arith.extui %0 : i1 to i32
    %c0_i32_0 = arith.constant 0 : i32
    %2 = arith.cmpi ne, %1, %c0_i32_0 : i32
    scf.if %2 {
      %cst_10 = arith.constant 0.000000e+00 : f32
      %14 = vector.broadcast %cst_10 : f32 to vector<8x8xf32>
      %c0_11 = arith.constant 0 : index
      %c0_12 = arith.constant 0 : index
      %c0_13 = arith.constant 0 : index
      %15 = vector.load %arg3[%c0_11, %c0_12, %c0_13] : memref<1x8x8xf32, #tpu.memory_space<vmem>>, vector<1x8x8xf32>
      %16 = vector.shape_cast %15 : vector<1x8x8xf32> to vector<8x8xf32>
      %17 = vector.shape_cast %14 : vector<8x8xf32> to vector<1x8x8xf32>
      tpu.vector_store %arg3[%c0_11, %c0_12, %c0_13], %17 {strides = array<i32>} : memref<1x8x8xf32, #tpu.memory_space<vmem>>, vector<1x8x8xf32>,
    } else {
    }
    %c0 = arith.constant 0 : index
    %c0_1 = arith.constant 0 : index
    %3 = vector.load %arg2[%c0, %c0_1] : memref<8x256xf32, #tpu.memory_space<vmem>>, vector<8x256xf32>
    %c0_2 = arith.constant 0 : index
    %c0_3 = arith.constant 0 : index
    %c0_4 = arith.constant 0 : index
    %4 = vector.load %arg3[%c0_2, %c0_3, %c0_4] : memref<1x8x8xf32, #tpu.memory_space<vmem>>, vector<1x8x8xf32>
    %5 = vector.shape_cast %4 : vector<1x8x8xf32> to vector<8x8xf32>
    %cst = arith.constant dense<0.000000e+00> : vector<8x8xf32>
    %6 = tpu.matmul %3, %3, %cst {dimension_numbers = #tpu.dot_dimension_numbers<[1], [1], [0], [0], [0, 0, 1, 0], [], []>} : vector<8x256xf32>, vector<8x256xf32>, vector<8x8xf32> -> vector<8x8xf32>
    %7 = arith.addf %5, %6 : vector<8x8xf32>
    %c0_5 = arith.constant 0 : index
    %c0_6 = arith.constant 0 : index
    %c0_7 = arith.constant 0 : index
    %8 = vector.load %arg3[%c0_5, %c0_6, %c0_7] : memref<1x8x8xf32, #tpu.memory_space<vmem>>, vector<1x8x8xf32>
    %9 = vector.shape_cast %8 : vector<1x8x8xf32> to vector<8x8xf32>
    %10 = vector.shape_cast %7 : vector<8x8xf32> to vector<1x8x8xf32>
    tpu.vector_store %arg3[%c0_5, %c0_6, %c0_7], %10 {strides = array<i32>} : memref<1x8x8xf32, #tpu.memory_space<vmem>>, vector<1x8x8xf32>,
    %c0_i32_8 = arith.constant 0 : i32
    %11 = arith.cmpi eq, %arg1, %c0_i32_8 : i32
    %12 = arith.extui %11 : i1 to i32
    %c0_i32_9 = arith.constant 0 : i32
    %13 = arith.cmpi ne, %12, %c0_i32_9 : i32
    scf.if %13 {
      %c0_10 = arith.constant 0 : index
      %c0_11 = arith.constant 0 : index
      %c0_12 = arith.constant 0 : index
      %14 = vector.load %arg3[%c0_10, %c0_11, %c0_12] : memref<1x8x8xf32, #tpu.memory_space<vmem>>, vector<1x8x8xf32>
      %15 = vector.shape_cast %14 : vector<1x8x8xf32> to vector<8x8xf32>
      %cst_13 = arith.constant 4.8828125E-4 : f32
      %16 = vector.broadcast %cst_13 : f32 to vector<8x8xf32>
      %17 = arith.mulf %15, %16 : vector<8x8xf32>
      %c0_14 = arith.constant 0 : index
      %c0_15 = arith.constant 0 : index
      %c0_16 = arith.constant 0 : index
      %18 = vector.load %arg3[%c0_14, %c0_15, %c0_16] : memref<1x8x8xf32, #tpu.memory_space<vmem>>, vector<1x8x8xf32>
      %19 = vector.shape_cast %18 : vector<1x8x8xf32> to vector<8x8xf32>
      %20 = vector.shape_cast %17 : vector<8x8xf32> to vector<1x8x8xf32>
      tpu.vector_store %arg3[%c0_14, %c0_15, %c0_16], %20 {strides = array<i32>} : memref<1x8x8xf32, #tpu.memory_space<vmem>>, vector<1x8x8xf32>,
    } else {
    }
    return
  }
  func.func @transform_0(%arg0: i32, %arg1: i32) -> (i32, i32) {
    %c1_i32 = arith.constant 1 : i32
    %0 = arith.muli %arg0, %c1_i32 : i32
    %1 = arith.addi %0, %arg1 : i32
    %c0_i32 = arith.constant 0 : i32
    %c0_i32_0 = arith.constant 0 : i32
    return %c0_i32, %1 : i32, i32
  }
  func.func @transform_1(%arg0: i32, %arg1: i32) -> (i32, i32, i32) {
    %c0_i32 = arith.constant 0 : i32
    %c0_i32_0 = arith.constant 0 : i32
    %c0_i32_1 = arith.constant 0 : i32
    return %arg0, %c0_i32, %c0_i32_0 : i32, i32, i32
  }
}

</mosaic_0001>

<bundles_post_ra>
// kernel: tpu_custom_call.1
= control target key start
LH: loop header
LB: loop body
LE: loop exit
PB: predicated region body
PF: predicated region fallthrough
CT: control target
= control target key end

     0   :  { %6 = vsyncpa [#allocation3], 0  ;;  %s181_s0 = inlined_call_operand.hbm [shape: f32[8,256], index: 0, kind: input, shape index: {}]   ;;  %s182_s1 = inlined_call_operand.hbm [shape: f32[1,8,8], index: 1, kind: output, shape index: {}]  }
   0x1   :  { %7 = vsyncpa [#allocation4], 0  ;;  %s17_s8 = sshll.u32 %s181_s0, 4  ;;  %s159_s9 = smov [#allocation2]   ;;  %s18_s8 = int_to_ptr.hbm [resolvable:$true] %s17_s8 }
   0x2   :  { %s19_s10 = sshll.u32 %s159_s9, 4  ;;  %s20_s10 = int_to_ptr.vmem [resolvable:$true] %s19_s10 }
   0x3   :  { %22 = dma.hbm_to_vmem [thread:$0]  %s18_s8, 256, %s20_s10, [#allocation3]  }
   0x4   :  { %155 = dma.done.wait [#allocation3], 256  }
   0x5   :  { %156 = vsyncadd [#allocation3], 4294967040  ;;  %v35_v0 = vld [vmem:[#allocation2] sm:$0xff]  ;;  %v36_v1 = vld [vmem:[#allocation2 + $0x8] sm:$0xff]  ;;  %vm33_vm0 = vcmask 64512   ;;  %v160_v2 = vmov 0.0  }
   0x6   :  { %53 = vmatpush.xpose.msra.mxu0 %v35_v0  ;;  %73 = vmatpush.xpose.msra.mxu1 %v36_v1  ;;  %34 = vst.msk [vmem:[#allocation5] sm:$0xff] %vm33_vm0, %v160_v2  ;;  %s161_s0 = smov [#allocation5]   ;;  %s94_s14 = sshll.u32 %s182_s1, 4  ;;  %s95_s14 = int_to_ptr.hbm [resolvable:$true] %s94_s14 }
   0x7   :  { %s92_s11 = sshll.u32 %s161_s0, 4  ;;  %s93_s11 = int_to_ptr.vmem [resolvable:$true] %s92_s11 }
   0x9   :  { %54 = vmatmul.f32.vlgmr.msra.gmra.mxu0 %v35_v0  ;;  %74 = vmatmul.f32.vlgmr.msra.gmra.mxu1 %v36_v1 }
   0xd   :  { %v37_v4 = vld [vmem:[#allocation5] sm:$0xff] }
  0x86   :  { %v55_v3 = vpop.f32.mrf.mxu0  ;;  %v75_v5 = vpop.f32.mrf.mxu1 }
  0x87   :  { %v76_v6 = vadd.f32 %v75_v5, %v55_v3 }
  0x89   :  { %v78_v7 = vadd.f32 %v76_v6, %v37_v4 }
  0x8b   :  { %80 = vst.msk [vmem:[#allocation5] sm:$0xff] %vm33_vm0, %v78_v7 }
  0x92   :  { %v84_v8 = vld [vmem:[#allocation5] sm:$0xff] }
  0x93   :  { %v85_v9 = vmul.f32 0.00048828125, %v84_v8 }
  0x95   :  { %86 = vst.msk [vmem:[#allocation5] sm:$0xff] %vm33_vm0, %v85_v9 }
  0x96   :  { %97 = dma.vmem_to_hbm [thread:$0]  %s93_s11, 128, %s95_s14, [#allocation4]  }
  0x97   :  { %157 = dma.done.wait [#allocation4], 128  }
  0x98   :  { %158 = vsyncadd [#allocation4], 4294967168 }
  0x99   :  { %102 = vsyncpa [#allocation3], 1 }
  0x9a   :  { %103 = vsyncpa [#allocation4], 1 }

</bundles_post_ra>
